<compile_context>
chip_gen: v6e
topology: v6e:2x2x1
jax: 0.10.0
libtpu: 0.0.40
codegen_flags: <defaults>
</compile_context>

<pallas_src>
import functools

import jax
import jax.numpy as jnp
from jax.experimental import pallas as pl
from jax.experimental.pallas import tpu as pltpu

_LANE = 128      # samples per row (lane width)
_SUB = 32        # row-count granularity (int8 sublane tiling is (32, 128))
_PAD_D = 1.0e30  # pad logit-diff: P[target] -> 1, loss contribution is exactly 0


def _binary_focal_partial_kernel(d_ref, t_ref, a_ref, o_ref, *, gamma):
    """Per-tile binary focal loss reduced to a (1, 128) lane-partial sum.

    d_ref: (BR, 128) f32  logit[target] - logit[other]   (P[target] = sigmoid(d)).
    t_ref: (BR, 128) i8   class id in {0, 1} (padded samples hold 0; irrelevant).
    a_ref: (2,)      f32  per-class alpha, in SMEM.
    o_ref: (1, 1, 128) f32 lane-partial sum of this tile's per-sample losses.
    """
    d = d_ref[...]
    t = t_ref[...].astype(jnp.float32)

    # Shared transcendentals (one exp + one log per sample):
    #   e = exp(-|d|) in (0, 1],  l = log(1 + e)
    #   log P[target]       = min(d, 0) - l      (stable log-sigmoid, never -inf)
    #   log (1 - P[target]) = -max(d, 0) - l
    e = jnp.exp(-jnp.abs(d))
    l = jnp.log(1.0 + e)
    log_p = jnp.minimum(d, 0.0) - l
    log_1mp = -jnp.maximum(d, 0.0) - l

    # (1-p)^gamma = exp(gamma * log(1-p)); log(1-p) <= 0 so this never overflows and
    # never evaluates log(0) / pow(0, gamma).  Padded samples (d = +1e30) give 0.
    focal = jnp.exp(gamma * log_1mp)

    a0 = a_ref[0]
    a1 = a_ref[1]
    alpha_n = a0 + (a1 - a0) * t            # binary per-sample alpha gather, pure VPU

    loss = alpha_n * focal * (-log_p)       # >= 0; exactly 0 on padded samples

    # Reduce rows -> one (1,128) lane-partial per tile (VALU adds + one sublane fold);
    # only num_tiles * 128 floats ever leave the kernel.
    o_ref[...] = jnp.sum(loss, axis=0, keepdims=True)[None]


def _ceil_div(a, b):
    return -(-a // b)


def _round_up(a, b):
    return _ceil_div(a, b) * b


def focal_loss(inputs, targets, alpha, gamma=2.0, size_average=True,
               tile_samples=512 * 1024):
    """inputs: (N, 2) float, targets: (N,) int, alpha: (2,) float -> scalar loss."""
    N, C = inputs.shape
    assert C == 2, "Pallas focal-loss kernel is specialized to class_num == 2"

    x = inputs.astype(jnp.float32)
    s = x[:, 1] - x[:, 0]
    d = jnp.where(targets == 1, s, -s)          # logit[target] - logit[other]

    # Tile geometry: rows of 128 samples, blocks of `block_rows` rows (multiple of 32
    # so the int8 stream tiles cleanly).  Cap keeps double-buffered VMEM ~5 MiB; the
    # "half" term aims for >= 2 grid steps so v7x's two TensorCores both get work.
    rows = _ceil_div(N, _LANE)
    cap_rows = max(_SUB, (int(tile_samples) // _LANE) // _SUB * _SUB)
    half_rows = _round_up(max(1, _ceil_div(rows, 2)), _SUB)
    block_rows = min(cap_rows, half_rows)
    num_tiles = _ceil_div(rows, block_rows)
    rows_pad = num_tiles * block_rows
    n_pad = rows_pad * _LANE

    # Padding fuses into the same elementwise pass; pad value gives exactly zero loss.
    d2 = jnp.pad(d, (0, n_pad - N), constant_values=_PAD_D).reshape(rows_pad, _LANE)
    t2 = jnp.pad(targets.astype(jnp.int8), (0, n_pad - N)).reshape(rows_pad, _LANE)
    a = jnp.asarray(alpha, dtype=jnp.float32).reshape(2)

    kernel = functools.partial(_binary_focal_partial_kernel, gamma=float(gamma))

    partials = pl.pallas_call(
        kernel,
        out_shape=jax.ShapeDtypeStruct((num_tiles, 1, _LANE), jnp.float32),
        grid=(num_tiles,),
        in_specs=[
            pl.BlockSpec((block_rows, _LANE), lambda i: (i, 0)),   # f32 logit diffs
            pl.BlockSpec((block_rows, _LANE), lambda i: (i, 0)),   # int8 class ids
            pl.BlockSpec(memory_space=pltpu.MemorySpace.SMEM),     # alpha scalars
        ],
        out_specs=pl.BlockSpec((1, 1, _LANE), lambda i: (i, 0, 0)),
        compiler_params=pltpu.CompilerParams(
            dimension_semantics=("parallel",)),
    )(d2, t2, a)

    total = jnp.sum(partials)                 # tiny: num_tiles * 128 floats
    if size_average:
        return total / jnp.float32(N)
    return total


def _focal_loss_ref(inputs, targets, alpha, gamma=2.0, size_average=True):
    p = jax.nn.softmax(inputs.astype(jnp.float32), axis=1)
    mask = jax.nn.one_hot(targets, inputs.shape[1], dtype=jnp.float32)
    probs = jnp.sum(p * mask, axis=1)
    log_p = jnp.log(probs)
    alpha_n = jnp.asarray(alpha, dtype=jnp.float32)[targets]
    batch_loss = -alpha_n * jnp.power(1.0 - probs, gamma) * log_p
    return jnp.mean(batch_loss) if size_average else jnp.sum(batch_loss)


if __name__ == "__main__":
    # Module config: class_num=2, alpha=[1, 8], gamma=2, size_average=True
    class_num = 2
    alpha = jnp.array([1.0, 8.0], dtype=jnp.float32)
    gamma = 2.0

    key = jax.random.PRNGKey(0)
    k1, k2, k3, k4 = jax.random.split(key, 4)

    # Case 1: small N, not a multiple of 128 -> exercises the zero-loss tail padding.
    N = 200
    inputs = jax.random.normal(k1, (N, class_num), dtype=jnp.float32)
    targets = jax.random.randint(k2, (N,), 0, class_num, dtype=jnp.int32)

    loss = jax.block_until_ready(
        focal_loss(inputs, targets, alpha, gamma=gamma, size_average=True))
    ref = _focal_loss_ref(inputs, targets, alpha, gamma=gamma, size_average=True)
    assert jnp.allclose(loss, ref, rtol=1e-5, atol=1e-6), (loss, ref)

    loss_sum = jax.block_until_ready(
        focal_loss(inputs, targets, alpha, gamma=gamma, size_average=False))
    ref_sum = _focal_loss_ref(inputs, targets, alpha, gamma=gamma, size_average=False)
    assert jnp.allclose(loss_sum, ref_sum, rtol=1e-5, atol=1e-5), (loss_sum, ref_sum)

    # Case 2: multi-tile "parallel" grid with a ragged final tile (force small tiles).
    N2 = 9000
    inputs2 = jax.random.normal(k3, (N2, class_num), dtype=jnp.float32)
    targets2 = jax.random.randint(k4, (N2,), 0, class_num, dtype=jnp.int32)
    loss2 = jax.block_until_ready(
        focal_loss(inputs2, targets2, alpha, gamma=gamma, size_average=True,
                   tile_samples=4096))
    ref2 = _focal_loss_ref(inputs2, targets2, alpha, gamma=gamma, size_average=True)
    assert jnp.allclose(loss2, ref2, rtol=1e-5, atol=1e-6), (loss2, ref2)

    # Case 3: extreme logits -- stable log-sigmoid path must stay finite and agree
    # with the reference while the reference itself is still finite.
    inputs3 = 8.0 * inputs
    loss3 = jax.block_until_ready(
        focal_loss(inputs3, targets, alpha, gamma=gamma, size_average=True))
    ref3 = _focal_loss_ref(inputs3, targets, alpha, gamma=gamma, size_average=True)
    assert jnp.isfinite(loss3), loss3
    assert jnp.allclose(loss3, ref3, rtol=1e-4, atol=1e-5), (loss3, ref3)

    print("KERNEL_OK")
</pallas_src>

<mosaic_0001>
module attributes {stable_mosaic.version = 11 : i64} {
  func.func @_binary_focal_partial_kernel(%arg0: i32, %arg1: memref<32x128xf32, #tpu.memory_space<vmem>>, %arg2: memref<32x128xi8, #tpu.memory_space<vmem>>, %arg3: memref<2xf32, #tpu.memory_space<smem>>, %arg4: memref<1x1x128xf32, #tpu.memory_space<vmem>>) attributes {dimension_semantics = [#tpu.dimension_semantics<parallel>], iteration_bounds = array<i64: 1>, scalar_prefetch = 0 : i64, scratch_operands = 0 : i64, tpu.core_type = #tpu.core_type<tc>, window_params = [{transform_indices = @transform_0, window_bounds = array<i64: 32, 128>}, {transform_indices = @transform_1, window_bounds = array<i64: 32, 128>}, {transform_indices = @transform_2, window_bounds = array<i64: 2>}, {transform_indices = @transform_3, window_bounds = array<i64: 1, 1, 128>}]} {
    %c0 = arith.constant 0 : index
    %c0_0 = arith.constant 0 : index
    %0 = vector.load %arg1[%c0, %c0_0] : memref<32x128xf32, #tpu.memory_space<vmem>>, vector<32x128xf32>
    %c0_1 = arith.constant 0 : index
    %c0_2 = arith.constant 0 : index
    %1 = vector.load %arg2[%c0_1, %c0_2] : memref<32x128xi8, #tpu.memory_space<vmem>>, vector<32x128xi8>
    %2 = arith.sitofp %1 : vector<32x128xi8> to vector<32x128xf32>
    %3 = math.absf %0 : vector<32x128xf32>
    %cst = arith.constant 0.000000e+00 : f32
    %4 = vector.broadcast %cst : f32 to vector<32x128xf32>
    %5 = arith.subf %4, %3 : vector<32x128xf32>
    %6 = math.exp %5 : vector<32x128xf32>
    %cst_3 = arith.constant 1.000000e+00 : f32
    %7 = vector.broadcast %cst_3 : f32 to vector<32x128xf32>
    %8 = arith.addf %7, %6 : vector<32x128xf32>
    %9 = math.log %8 : vector<32x128xf32>
    %cst_4 = arith.constant 0.000000e+00 : f32
    %10 = vector.broadcast %cst_4 : f32 to vector<32x128xf32>
    %11 = arith.minimumf %0, %10 : vector<32x128xf32>
    %12 = arith.subf %11, %9 : vector<32x128xf32>
    %cst_5 = arith.constant 0.000000e+00 : f32
    %13 = vector.broadcast %cst_5 : f32 to vector<32x128xf32>
    %14 = arith.maximumf %0, %13 : vector<32x128xf32>
    %cst_6 = arith.constant 0.000000e+00 : f32
    %15 = vector.broadcast %cst_6 : f32 to vector<32x128xf32>
    %16 = arith.subf %15, %14 : vector<32x128xf32>
    %17 = arith.subf %16, %9 : vector<32x128xf32>
    %cst_7 = arith.constant 2.000000e+00 : f32
    %18 = vector.broadcast %cst_7 : f32 to vector<32x128xf32>
    %19 = arith.mulf %18, %17 : vector<32x128xf32>
    %20 = math.exp %19 : vector<32x128xf32>
    %c0_8 = arith.constant 0 : index
    %21 = memref.load %arg3[%c0_8] : memref<2xf32, #tpu.memory_space<smem>>
    %c1 = arith.constant 1 : index
    %22 = memref.load %arg3[%c1] : memref<2xf32, #tpu.memory_space<smem>>
    %23 = arith.subf %22, %21 : f32
    %24 = vector.broadcast %23 : f32 to vector<32x128xf32>
    %25 = arith.mulf %24, %2 : vector<32x128xf32>
    %26 = vector.broadcast %21 : f32 to vector<32x128xf32>
    %27 = arith.addf %26, %25 : vector<32x128xf32>
    %28 = arith.mulf %27, %20 : vector<32x128xf32>
    %cst_9 = arith.constant 0.000000e+00 : f32
    %29 = vector.broadcast %cst_9 : f32 to vector<32x128xf32>
    %30 = arith.subf %29, %12 : vector<32x128xf32>
    %31 = arith.mulf %28, %30 : vector<32x128xf32>
    %cst_10 = arith.constant dense<0.000000e+00> : vector<128xf32>
    %32 = vector.multi_reduction <add>, %31, %cst_10 [0] : vector<32x128xf32> to vector<128xf32>
    %33 = vector.shape_cast %32 : vector<128xf32> to vector<1x128xf32>
    %34 = vector.shape_cast %33 : vector<1x128xf32> to vector<1x1x128xf32>
    %c0_11 = arith.constant 0 : index
    %c0_12 = arith.constant 0 : index
    %c0_13 = arith.constant 0 : index
    %35 = vector.load %arg4[%c0_11, %c0_12, %c0_13] : memref<1x1x128xf32, #tpu.memory_space<vmem>>, vector<1x1x128xf32>
    tpu.vector_store %arg4[%c0_11, %c0_12, %c0_13], %34 {strides = array<i32>} : memref<1x1x128xf32, #tpu.memory_space<vmem>>, vector<1x1x128xf32>,
    return
  }
  func.func @transform_0(%arg0: i32) -> (i32, i32) {
    %c0_i32 = arith.constant 0 : i32
    %c0_i32_0 = arith.constant 0 : i32
    return %arg0, %c0_i32 : i32, i32
  }
  func.func @transform_1(%arg0: i32) -> (i32, i32) {
    %c0_i32 = arith.constant 0 : i32
    %c0_i32_0 = arith.constant 0 : i32
    return %arg0, %c0_i32 : i32, i32
  }
  func.func @transform_2(%arg0: i32) -> i32 {
    %c0_i32 = arith.constant 0 : i32
    %c0_i32_0 = arith.constant 0 : i32
    return %c0_i32 : i32
  }
  func.func @transform_3(%arg0: i32) -> (i32, i32, i32) {
    %c0_i32 = arith.constant 0 : i32
    %c0_i32_0 = arith.constant 0 : i32
    %c0_i32_1 = arith.constant 0 : i32
    return %arg0, %c0_i32, %c0_i32_0 : i32, i32, i32
  }
}

</mosaic_0001>

<bundles_post_ra>
// kernel: tpu_custom_call.1
= control target key start
LH: loop header
LB: loop body
LE: loop exit
PB: predicated region body
PF: predicated region fallthrough
CT: control target
= control target key end

     0   :  { %8 = vsyncpa [#allocation3], 0  ;;  %s355_s0 = inlined_call_operand.hbm [shape: f32[32,128], index: 0, kind: input, shape index: {}]   ;;  %s356_s1 = inlined_call_operand.hbm [shape: s8[32,128], index: 1, kind: input, shape index: {}]   ;;  %s357_s2 = inlined_call_operand.vmem [shape: f32[2], index: 2, kind: input, shape index: {}]   ;;  %s358_s3 = inlined_call_operand.hbm [shape: f32[1,1,128], index: 3, kind: output, shape index: {}]  }
   0x1   :  { %9 = vsyncpa [#allocation7], 0 }
   0x2   :  { %10 = vsyncpa [#allocation5], 0 }
   0x3   :  { %11 = vsyncpa [#allocation4], 0  ;;  %s290_s12 = smov [#allocation2]  }
   0x4   :  { %s17_s13 = sshll.u32 %s290_s12, 4  ;;  %s18_s13 = int_to_ptr.vmem [resolvable:$true] %s17_s13 }
   0x5   :  { %s218_s14 = scalar_lea.vmem %s18_s13, 512  ;;  %p223_p1 = scmp.lt.s32.totalorder %s18_s13, %s18_s13 }
   0x6   :  { %p219_p0 = scmp.ne.s32.totalorder %s18_s13, %s218_s14  ;;  %p224_p2 = scmp.lt.s32.totalorder %s218_s14, %s218_s14 }
   0x8   :  { %p225_p3 = por %p224_p2, %p223_p1 }
   0xa   :  { %p226_p4 = pnand %p225_p3, %p219_p0 }
   0xc   :  { %229 = shalt.err (!%p226_p4)
}
   0xd   :  { %s291_s15 = smov 128   ;;  %s292_s16 = smov 8  }
   0xe   :  { %23 = dma.hbm_to_vmem [thread:$0]  %s355_s0, 512, %s18_s13, [#allocation3], %s291_s15, %s291_s15, %s292_s16  }
   0xf   :  { %s293_s19 = smov [#allocation6]   ;;  %s40_s23 = sshll.u32 %s357_s2, 4  ;;  %s41_s23 = int_to_ptr.vmem [resolvable:$true] %s40_s23 }
  0x10   :  { %s30_s20 = sshll.u32 %s293_s19, 4  ;;  %s31_s20 = int_to_ptr.vmem [resolvable:$true] %s30_s20 }
  0x11   :  { %s238_s24 = scalar_lea.vmem %s31_s20, 128  ;;  %p243_p6 = scmp.lt.s32.totalorder %s31_s20, %s31_s20 }
  0x12   :  { %p239_p5 = scmp.ne.s32.totalorder %s31_s20, %s238_s24  ;;  %p244_p7 = scmp.lt.s32.totalorder %s238_s24, %s238_s24 }
  0x14   :  { %p245_p8 = por %p244_p7, %p243_p6 }
  0x16   :  { %p246_p9 = pnand %p245_p8, %p239_p5 }
  0x18   :  { %249 = shalt.err (!%p246_p9)
}
  0x19   :  { %33 = dma.hbm_to_vmem [thread:$0]  %s356_s1, 128, %s31_s20, [#allocation7]  }
  0x1a   :  { %s250_s0 = scalar_lea.vmem %s41_s23, 16  ;;  %p255_p11 = scmp.lt.s32.totalorder %s41_s23, %s41_s23 }
  0x1b   :  { %p251_p10 = scmp.ne.s32.totalorder %s41_s23, %s250_s0  ;;  %p256_p12 = scmp.lt.s32.totalorder %s250_s0, %s250_s0 }
  0x1d   :  { %p257_p13 = por %p256_p12, %p255_p11 }
  0x1f   :  { %p258_p0 = pnand %p257_p13, %p251_p10 }
  0x21   :  { %261 = shalt.err (!%p258_p0)
}
  0x22   :  { %s294_s2 = smov [#allocation8]  }
  0x23   :  { %43 = dma.vmem_to_smem %s41_s23, 16, %s294_s2, [#allocation5]  }
  0x24   :  { %282 = dma.done.wait [#allocation3], 512  }
  0x25   :  { %283 = vsyncadd [#allocation3], 4294966784 }
  0x26   :  { %284 = dma.done.wait [#allocation7], 128  }
  0x27   :  { %285 = vsyncadd [#allocation7], 4294967168 }
  0x28   :  { %286 = dma.done.wait [#allocation5], 16  }
  0x29   :  { %287 = vsyncadd [#allocation5], 4294967280 }
  0x2a   :  { %53 = sfence }
  0x2b   :  { %v325_v0 = vld [vmem:[#allocation2] sm:$0xff]  ;;  %v327_v1 = vld [vmem:[#allocation2 + $0x8] sm:$0xff]  ;;  %v329_v2 = vld [vmem:[#allocation2 + $0x10] sm:$0xff]  ;;  %s341_s1 = sld [smem:[#allocation8]]  ;;  %s295_s29 = smov [#allocation9]  }
  0x2c   :  { %v331_v3 = vld [vmem:[#allocation2 + $0x18] sm:$0xff]  ;;  %v67_v4 = vand.u32 2147483647, %v325_v0  ;;  %v68_v5 = vand.u32 2147483647, %v327_v1  ;;  %v103_v24 = vmax.f32 %v325_v0, 0.0 }
  0x2d   :  { %v69_v6 = vand.u32 2147483647, %v329_v2  ;;  %v70_v7 = vand.u32 2147483647, %v331_v3  ;;  %v104_v25 = vmax.f32 %v327_v1, 0.0  ;;  %v105_v26 = vmax.f32 %v329_v2, 0.0 }
  0x2e   :  { %v71_v8 = vsub.f32 0.0, %v67_v4  ;;  %v72_v9 = vsub.f32 0.0, %v68_v5  ;;  %v106_v27 = vmax.f32 %v331_v3, 0.0  ;;  %v107_v28 = vsub.f32 0.0, %v103_v24  ;;  %s343_s27 = sld [smem:[#allocation8 + $0x1]]  ;;  %v58_v40 = vld [vmem:[#allocation6] sm:$0xff] }
  0x2f   :  { %v73_v10 = vsub.f32 0.0, %v69_v6  ;;  %v74_v11 = vsub.f32 0.0, %v70_v7  ;;  %v108_v30 = vsub.f32 0.0, %v104_v25  ;;  %v109_v33 = vsub.f32 0.0, %v105_v26  ;;  %s168_s30 = sshll.u32 %s295_s29, 4  ;;  %s169_s30 = int_to_ptr.vmem [resolvable:$true] %s168_s30 }
  0x30   :  { %v75_v12 = vmul.f32 1.442695, %v71_v8  ;;  %v77_v13 = vmul.f32 1.442695, %v72_v9  ;;  %v110_v36 = vsub.f32 0.0, %v106_v27  ;;  %v59_v47 = vunpack.c.0.s8 %v58_v40  ;;  %s262_s4 = scalar_lea.vmem %s169_s30, 16  ;;  %p267_p2 = scmp.lt.s32.totalorder %s169_s30, %s169_s30 }
  0x31   :  { %v79_v14 = vmul.f32 1.442695, %v73_v10  ;;  %v81_v15 = vmul.f32 1.442695, %v74_v11  ;;  %v60_v50 = vunpack.c.1.s8 %v58_v40  ;;  %v61_v53 = vunpack.c.2.s8 %v58_v40  ;;  %p263_p1 = scmp.ne.s32.totalorder %s169_s30, %s262_s4  ;;  %s266_s5 = scalar_lea.vmem %s169_s30, 32 }
  0x32   :  { %186 = vpow2.f32 %v75_v12  ;;  %v62_v55 = vunpack.c.3.s8 %v58_v40  ;;  %v63_v57 = vcvt.s32.f32 %v59_v47  ;;  %v95_v61 = vmin.f32 %v325_v0, 0.0  ;;  %p268_p3 = scmp.lt.s32.totalorder %s266_s5, %s262_s4 }
  0x33   :  { %188 = vpow2.f32 %v77_v13  ;;  %v64_v58 = vcvt.s32.f32 %v60_v50  ;;  %v65_v60 = vcvt.s32.f32 %v61_v53  ;;  %v96_v63 = vmin.f32 %v327_v1, 0.0 }
  0x34   :  { %190 = vpow2.f32 %v79_v14  ;;  %s129_s28 = ssub.f32 %s343_s27, %s341_s1  ;;  %v66_v62 = vcvt.s32.f32 %v62_v55  ;;  %v97_v4 = vmin.f32 %v329_v2, 0.0  ;;  %v98_v6 = vmin.f32 %v331_v3, 0.0  ;;  %p269_p4 = por %p268_p3, %p267_p2 }
  0x35   :  { %192 = vpow2.f32 %v81_v15  ;;  %v135_v8 = vstv %s341_s1 }
  0x36   :  { %v130_v59 = vstv %s129_s28  ;;  %p270_p5 = pnand %p269_p4, %p263_p1 }
  0x37   :  { %v131_v5 = vmul.f32 %v130_v59, %v63_v57  ;;  %v132_v7 = vmul.f32 %v130_v59, %v64_v58  ;;  %v133_v10 = vmul.f32 %v130_v59, %v65_v60  ;;  %v134_v12 = vmul.f32 %v130_v59, %v66_v62 }
  0x39   :  { %v136_v14 = vadd.f32 %v135_v8, %v131_v5 }
  0x3f   :  { %v187_v16 = vpop.eup %186 }
  0x40   :  { %v189_v17 = vpop.eup %188  ;;  %v83_v18 = vadd.f32 1.0, %v187_v16  ;;  %v137_v16 = vadd.f32 %v135_v8, %v132_v7 }
  0x41   :  { %v191_v19 = vpop.eup %190  ;;  %v84_v20 = vadd.f32 1.0, %v189_v17  ;;  %v138_v17 = vadd.f32 %v135_v8, %v133_v10 }
  0x42   :  { %v193_v21 = vpop.eup %192  ;;  %v85_v22 = vadd.f32 1.0, %v191_v19  ;;  %194 = vlog2.f32 %v83_v18  ;;  %v139_v19 = vadd.f32 %v135_v8, %v134_v12 }
  0x43   :  { %v86_v23 = vadd.f32 1.0, %v193_v21  ;;  %196 = vlog2.f32 %v84_v20 }
  0x44   :  { %198 = vlog2.f32 %v85_v22 }
  0x45   :  { %200 = vlog2.f32 %v86_v23 }
  0x4f   :  { %v195_v29 = vpop.eup %194 }
  0x50   :  { %v197_v31 = vpop.eup %196  ;;  %v88_v32 = vmul.f32 0.6931472, %v195_v29 }
  0x51   :  { %v199_v34 = vpop.eup %198  ;;  %v90_v35 = vmul.f32 0.6931472, %v197_v31 }
  0x52   :  { %v201_v37 = vpop.eup %200  ;;  %v92_v38 = vmul.f32 0.6931472, %v199_v34  ;;  %v111_v39 = vsub.f32 %v107_v28, %v88_v32  ;;  %v99_v9 = vsub.f32 %v95_v61, %v88_v32 }
  0x53   :  { %v94_v41 = vmul.f32 0.6931472, %v201_v37  ;;  %v112_v42 = vsub.f32 %v108_v30, %v90_v35  ;;  %v100_v11 = vsub.f32 %v96_v63, %v90_v35 }
  0x54   :  { %v113_v43 = vsub.f32 %v109_v33, %v92_v38  ;;  %v115_v44 = vmul.f32 2.0, %v111_v39  ;;  %v101_v13 = vsub.f32 %v97_v4, %v92_v38  ;;  %v144_v0 = vsub.f32 0.0, %v99_v9 }
  0x55   :  { %v114_v45 = vsub.f32 %v110_v36, %v94_v41  ;;  %v116_v46 = vmul.f32 2.0, %v112_v42  ;;  %v102_v15 = vsub.f32 %v98_v6, %v94_v41  ;;  %v145_v1 = vsub.f32 0.0, %v100_v11 }
  0x56   :  { %v117_v48 = vmul.f32 2.0, %v113_v43  ;;  %v119_v49 = vmul.f32 1.442695, %v115_v44  ;;  %v146_v21 = vsub.f32 0.0, %v101_v13 }
  0x57   :  { %v118_v51 = vmul.f32 2.0, %v114_v45  ;;  %v121_v52 = vmul.f32 1.442695, %v116_v46  ;;  %v147_v23 = vsub.f32 0.0, %v102_v15 }
  0x58   :  { %202 = vpow2.f32 %v119_v49  ;;  %v123_v54 = vmul.f32 1.442695, %v117_v48 }
  0x59   :  { %204 = vpow2.f32 %v121_v52  ;;  %v125_v56 = vmul.f32 1.442695, %v118_v51 }
  0x5a   :  { %206 = vpow2.f32 %v123_v54 }
  0x5b   :  { %208 = vpow2.f32 %v125_v56 }
  0x65   :  { %v203_v18 = vpop.eup %202 }
  0x66   :  { %v205_v20 = vpop.eup %204  ;;  %v140_v2 = vmul.f32 %v203_v18, %v136_v14 }
  0x67   :  { %v207_v22 = vpop.eup %206  ;;  %v141_v3 = vmul.f32 %v205_v20, %v137_v16 }
  0x68   :  { %v209_v24 = vpop.eup %208  ;;  %v142_v25 = vmul.f32 %v207_v22, %v138_v17  ;;  %v148_v26 = vmul.f32 %v144_v0, %v140_v2 }
  0x69   :  { %v143_v27 = vmul.f32 %v209_v24, %v139_v19  ;;  %v149_v28 = vmul.f32 %v145_v1, %v141_v3 }
  0x6a   :  { %v150_v29 = vmul.f32 %v146_v21, %v142_v25 }
  0x6b   :  { %v151_v30 = vmul.f32 %v147_v23, %v143_v27  ;;  %v152_v31 = vadd.f32 %v149_v28, %v148_v26 }
  0x6d   :  { %v153_v32 = vadd.f32 %v152_v31, %v150_v29 }
  0x6f   :  { %v154_v33 = vadd.f32 %v153_v32, %v151_v30 }
  0x71   :  { %v155_v34 = vrot.slane %v154_v33, 4 }
  0x73   :  { %v156_v35 = vadd.f32 %v155_v34, %v154_v33 }
  0x75   :  { %v157_v36 = vrot.slane %v156_v35, 2 }
  0x77   :  { %v158_v37 = vadd.f32 %v157_v36, %v156_v35 }
  0x79   :  { %v159_v38 = vrot.slane %v158_v37, 1 }
  0x7b   :  { %v160_v39 = vadd.f32 %v159_v38, %v158_v37 }
  0x7d   :  { %161 = vst [vmem:[#allocation9] sm:$0x1] %v160_v39 }
  0x7e   :  { %273 = shalt.err (!%p270_p5)
}
  0x7f   :  { %171 = dma.vmem_to_hbm [thread:$0]  %s169_s30, 16, %s358_s3, [#allocation4]  }
  0x80   :  { %288 = dma.done.wait [#allocation4], 16  }
  0x81   :  { %289 = vsyncadd [#allocation4], 4294967280 }
  0x82   :  { %175 = vsyncpa [#allocation3], 1 }
  0x83   :  { %176 = vsyncpa [#allocation7], 1 }
  0x84   :  { %177 = vsyncpa [#allocation4], 1 }
  0x85   :  { %178 = vsyncpa [#allocation5], 1 }

</bundles_post_ra>
